<compile_context>
chip_gen: v6e
topology: v6e:2x2x1
jax: 0.10.0
libtpu: 0.0.40
codegen_flags: <defaults>
</compile_context>

<pallas_src>
import functools

import jax
import jax.numpy as jnp
from jax import lax
from jax.experimental import pallas as pl
from jax.experimental.pallas import tpu as pltpu

ALPHA = 0.99
GAMMA = 2
IGNORE_INDEX = 255


def _focal_ce_kernel(preds_ref, labels_ref, sum_ref, cnt_ref, *,
                     ignore_index, hw, tk, mask_tail):
    s_i = pl.program_id(1)

    # Per-image accumulator blocks: fresh at the start of every image's spatial
    # sweep (the output block index only depends on the parallel N axis).
    @pl.when(s_i == 0)
    def _init():
        sum_ref[...] = jnp.zeros_like(sum_ref)
        cnt_ref[...] = jnp.zeros_like(cnt_ref)

    logits = preds_ref[...].astype(jnp.float32)      # (C, tk), classes on sublanes
    labels = labels_ref[...]                         # (1, tk) int32

    # Numerically stable softmax pieces over the class (sublane) axis.
    m = jnp.max(logits, axis=0, keepdims=True)                       # (1, tk)
    z = logits - m                                                   # (C, tk)
    sum_exp = jnp.sum(jnp.exp(z), axis=0, keepdims=True)             # (1, tk)

    # Target (shifted) logit via one-hot select; (C, 1) iota broadcasts against
    # the (1, tk) labels -- no full (C, tk) iota materialized per step.
    class_ids = lax.broadcasted_iota(jnp.int32, (logits.shape[0], 1), 0)   # (C, 1)
    one_hot = class_ids == labels                                          # (C, tk)
    tgt_z = jnp.sum(jnp.where(one_hot, z, 0.0), axis=0, keepdims=True)     # (1, tk)

    # Valid = not ignore_index (and, only when HW % tk != 0, inside the real
    # spatial extent -- trace-time conditional so the common case skips 3 VPU ops).
    valid = labels != ignore_index                                         # (1, tk)
    if mask_tail:
        pos = s_i * tk + lax.broadcasted_iota(jnp.int32, (1, tk), 1)       # (1, tk)
        valid = jnp.logical_and(valid, pos < hw)

    # ce = lse - tgt  ==  log(sum_exp) - tgt_z   (the `m` terms cancel).
    ce = jnp.where(valid, jnp.log(sum_exp) - tgt_z, 0.0)                   # (1, tk)

    # Lane-wise accumulation only; the cross-lane reduce happens once, in JAX.
    sum_ref[...] += ce
    cnt_ref[...] += valid.astype(jnp.float32)


def _vmem_config():
    """Generation-aware (block budget bytes, vmem_limit_bytes or None)."""
    kind = ""
    try:
        kind = jax.devices()[0].device_kind.lower()
    except Exception:
        pass
    if "v7" in kind:
        # v7x: only 64 MiB VMEM per TensorCore -- keep double-buffering alive.
        return 20 << 20, 48 << 20
    if "tpu" in kind or kind.startswith("v"):
        # v5e / v6e: 128 MiB physical, but default scoped limit is only 16/32 MiB.
        return 32 << 20, 80 << 20
    # Unknown backend (e.g. interpret mode): conservative, no limit override.
    return 8 << 20, None


def _pick_tk(hw, c, itemsize, vmem_budget_bytes, tk_max=65536):
    """Largest lane tile whose buffers fit the budget; prefer tk dividing HW."""
    # Per-lane-column VMEM bytes: double-buffered preds + labels blocks, the two
    # f32 per-image accumulator blocks, plus headroom for in-kernel f32 temps.
    bytes_per_lane = (2 * c * itemsize          # preds block, double-buffered
                      + 2 * 4                   # labels block (i32), double-buffered
                      + 2 * 2 * 4               # two f32 accumulator outputs
                      + 3 * c * 4 + 6 * 4)      # f32 temporaries headroom
    budget_tk = (vmem_budget_bytes // bytes_per_lane) // 128 * 128
    cap = int(max(128, min(tk_max, budget_tk)))
    if hw <= cap:
        return int(hw)          # one block spans the full spatial axis (legal: == dim)
    # Prefer a lane-aligned tile that divides HW exactly (no ragged-tail mask),
    # but never shrink below half the budgeted cap for it.
    lo = max(cap // 2, 128)
    for tk in range(cap, lo - 1, -128):
        if hw % tk == 0:
            return tk
    return cap


def focal_loss(preds, labels, *, alpha=ALPHA, gamma=GAMMA,
               ignore_index=IGNORE_INDEX, tk=None):
    """preds: (N, C, H, W) float (f32 or bf16); labels: (N, H, W) int. Scalar f32."""
    N, C, H, W = preds.shape
    HW = H * W

    # Free reshapes only -- no NCHW->NHWC transpose, no padding copies.
    x = preds.reshape(N, C, HW)                        # classes on sublanes
    y = labels.astype(jnp.int32).reshape(N, 1, HW)     # spatial lane-dense

    vmem_budget, vmem_limit = _vmem_config()
    if tk is None:
        tk = _pick_tk(HW, C, x.dtype.itemsize, vmem_budget)
    s_blocks = pl.cdiv(HW, tk)
    mask_tail = (HW % tk) != 0

    kernel = functools.partial(_focal_ce_kernel, ignore_index=ignore_index,
                               hw=HW, tk=tk, mask_tail=mask_tail)

    M = N * HW
    cost = pl.CostEstimate(
        flops=int(7 * M * C),
        transcendentals=int(M * C + M),          # exp per logit + log per pixel
        bytes_accessed=int(x.size * x.dtype.itemsize + y.size * 4
                           + 2 * N * tk * 4),
    )

    cp_kwargs = dict(dimension_semantics=("parallel", "arbitrary"))
    if vmem_limit is not None:
        cp_kwargs["vmem_limit_bytes"] = int(vmem_limit)

    sum_parts, cnt_parts = pl.pallas_call(
        kernel,
        out_shape=(jax.ShapeDtypeStruct((N, 1, tk), jnp.float32),
                   jax.ShapeDtypeStruct((N, 1, tk), jnp.float32)),
        grid_spec=pltpu.PrefetchScalarGridSpec(
            num_scalar_prefetch=0,
            grid=(N, s_blocks),
            in_specs=[
                pl.BlockSpec((None, C, tk), lambda n, s: (n, 0, s)),
                pl.BlockSpec((None, 1, tk), lambda n, s: (n, 0, s)),
            ],
            out_specs=(
                pl.BlockSpec((None, 1, tk), lambda n, s: (n, 0, 0)),
                pl.BlockSpec((None, 1, tk), lambda n, s: (n, 0, 0)),
            ),
        ),
        compiler_params=pltpu.CompilerParams(**cp_kwargs),
        cost_estimate=cost,
    )(x, y)

    # Tiny epilogue in plain JAX: cross-lane / cross-image reduce + focal transform.
    total = jnp.sum(sum_parts)
    cnt = jnp.sum(cnt_parts)
    # NaN if every label == ignore_index (matches PyTorch CrossEntropyLoss).
    mean_ce = total / cnt
    logpt = -mean_ce
    pt = jnp.exp(logpt)
    return -((1.0 - pt) ** gamma) * alpha * logpt


def _reference(preds, labels, *, alpha=ALPHA, gamma=GAMMA,
               ignore_index=IGNORE_INDEX):
    # Pure-JAX reference mirroring nn.CrossEntropyLoss(ignore_index=255) + focal.
    N, C, H, W = preds.shape
    x = jnp.transpose(preds, (0, 2, 3, 1)).reshape(-1, C).astype(jnp.float32)
    y = labels.reshape(-1).astype(jnp.int32)
    lse = jax.nn.logsumexp(x, axis=-1)
    tgt = jnp.take_along_axis(
        x, jnp.clip(y, 0, C - 1)[:, None], axis=-1)[:, 0]
    valid = y != ignore_index
    ce = jnp.where(valid, lse - tgt, 0.0)
    mean_ce = jnp.sum(ce) / jnp.sum(valid.astype(jnp.float32))
    logpt = -mean_ce
    pt = jnp.exp(logpt)
    return -((1.0 - pt) ** gamma) * alpha * logpt


if __name__ == "__main__":
    key = jax.random.PRNGKey(0)
    k1, k2, k3 = jax.random.split(key, 3)

    N, C, H, W = 2, 4, 16, 16
    preds = jax.random.normal(k1, (N, C, H, W), dtype=jnp.float32)
    labels = jax.random.randint(k2, (N, H, W), 0, C, dtype=jnp.int32)
    # Sprinkle in some ignore_index pixels to exercise masking.
    ignore_mask = jax.random.bernoulli(k3, 0.1, (N, H, W))
    labels = jnp.where(ignore_mask, IGNORE_INDEX, labels)

    loss = focal_loss(preds, labels)
    loss = jax.block_until_ready(loss)

    ref = _reference(preds, labels)
    assert jnp.allclose(loss, ref, rtol=1e-5, atol=1e-6), (loss, ref)

    print("KERNEL_OK")
</pallas_src>

<mosaic_0001>
module attributes {stable_mosaic.version = 11 : i64} {
  func.func @_focal_ce_kernel(%arg0: i32, %arg1: i32, %arg2: memref<1x4x256xf32, #tpu.memory_space<vmem>>, %arg3: memref<1x1x256xi32, #tpu.memory_space<vmem>>, %arg4: memref<1x1x256xf32, #tpu.memory_space<vmem>>, %arg5: memref<1x1x256xf32, #tpu.memory_space<vmem>>) attributes {dimension_semantics = [#tpu.dimension_semantics<parallel>, #tpu.dimension_semantics<arbitrary>], iteration_bounds = array<i64: 2, 1>, scalar_prefetch = 0 : i64, scratch_operands = 0 : i64, tpu.core_type = #tpu.core_type<tc>, window_params = [{transform_indices = @transform_0, window_bounds = array<i64: 1, 4, 256>}, {transform_indices = @transform_1, window_bounds = array<i64: 1, 1, 256>}, {transform_indices = @transform_2, window_bounds = array<i64: 1, 1, 256>}, {transform_indices = @transform_3, window_bounds = array<i64: 1, 1, 256>}]} {
    %c0_i32 = arith.constant 0 : i32
    %0 = arith.cmpi eq, %arg1, %c0_i32 : i32
    %1 = arith.extui %0 : i1 to i32
    %c0_i32_0 = arith.constant 0 : i32
    %2 = arith.cmpi ne, %1, %c0_i32_0 : i32
    scf.if %2 {
      %cst_22 = arith.constant 0.000000e+00 : f32
      %42 = vector.broadcast %cst_22 : f32 to vector<1x256xf32>
      %c0_23 = arith.constant 0 : index
      %c0_24 = arith.constant 0 : index
      %c0_25 = arith.constant 0 : index
      %43 = vector.load %arg4[%c0_23, %c0_24, %c0_25] : memref<1x1x256xf32, #tpu.memory_space<vmem>>, vector<1x1x256xf32>
      %44 = vector.shape_cast %43 : vector<1x1x256xf32> to vector<1x256xf32>
      %45 = vector.shape_cast %42 : vector<1x256xf32> to vector<1x1x256xf32>
      tpu.vector_store %arg4[%c0_23, %c0_24, %c0_25], %45 {strides = array<i32>} : memref<1x1x256xf32, #tpu.memory_space<vmem>>, vector<1x1x256xf32>,
      %cst_26 = arith.constant 0.000000e+00 : f32
      %46 = vector.broadcast %cst_26 : f32 to vector<1x256xf32>
      %c0_27 = arith.constant 0 : index
      %c0_28 = arith.constant 0 : index
      %c0_29 = arith.constant 0 : index
      %47 = vector.load %arg5[%c0_27, %c0_28, %c0_29] : memref<1x1x256xf32, #tpu.memory_space<vmem>>, vector<1x1x256xf32>
      %48 = vector.shape_cast %47 : vector<1x1x256xf32> to vector<1x256xf32>
      %49 = vector.shape_cast %46 : vector<1x256xf32> to vector<1x1x256xf32>
      tpu.vector_store %arg5[%c0_27, %c0_28, %c0_29], %49 {strides = array<i32>} : memref<1x1x256xf32, #tpu.memory_space<vmem>>, vector<1x1x256xf32>,
    } else {
    }
    %c0 = arith.constant 0 : index
    %c0_1 = arith.constant 0 : index
    %c0_2 = arith.constant 0 : index
    %3 = vector.load %arg2[%c0, %c0_1, %c0_2] : memref<1x4x256xf32, #tpu.memory_space<vmem>>, vector<1x4x256xf32>
    %4 = vector.shape_cast %3 : vector<1x4x256xf32> to vector<4x256xf32>
    %c0_3 = arith.constant 0 : index
    %c0_4 = arith.constant 0 : index
    %c0_5 = arith.constant 0 : index
    %5 = vector.load %arg3[%c0_3, %c0_4, %c0_5] : memref<1x1x256xi32, #tpu.memory_space<vmem>>, vector<1x1x256xi32>
    %6 = vector.shape_cast %5 : vector<1x1x256xi32> to vector<1x256xi32>
    %cst = arith.constant dense<0xFF800000> : vector<256xf32>
    %7 = vector.multi_reduction <maximumf>, %4, %cst [0] : vector<4x256xf32> to vector<256xf32>
    %8 = vector.shape_cast %7 : vector<256xf32> to vector<1x256xf32>
    %9 = vector.broadcast %8 : vector<1x256xf32> to vector<4x256xf32>
    %10 = arith.subf %4, %9 : vector<4x256xf32>
    %11 = math.exp %10 : vector<4x256xf32>
    %cst_6 = arith.constant dense<0.000000e+00> : vector<256xf32>
    %12 = vector.multi_reduction <add>, %11, %cst_6 [0] : vector<4x256xf32> to vector<256xf32>
    %13 = vector.shape_cast %12 : vector<256xf32> to vector<1x256xf32>
    %14 = tpu.iota {dimensions = array<i32: 0>} : vector<4x1xi32>
    %15 = vector.broadcast %14 : vector<4x1xi32> to vector<4x256xi32>
    %16 = vector.broadcast %6 : vector<1x256xi32> to vector<4x256xi32>
    %17 = arith.cmpi eq, %15, %16 : vector<4x256xi32>
    %cst_7 = arith.constant 0.000000e+00 : f32
    %18 = vector.broadcast %cst_7 : f32 to vector<4x256xf32>
    %19 = arith.select %17, %10, %18 : vector<4x256xi1>, vector<4x256xf32>
    %cst_8 = arith.constant dense<0.000000e+00> : vector<256xf32>
    %20 = vector.multi_reduction <add>, %19, %cst_8 [0] : vector<4x256xf32> to vector<256xf32>
    %21 = vector.shape_cast %20 : vector<256xf32> to vector<1x256xf32>
    %c255_i32 = arith.constant 255 : i32
    %22 = vector.broadcast %c255_i32 : i32 to vector<1x256xi32>
    %23 = arith.cmpi ne, %6, %22 : vector<1x256xi32>
    %24 = math.log %13 : vector<1x256xf32>
    %25 = arith.subf %24, %21 : vector<1x256xf32>
    %cst_9 = arith.constant 0.000000e+00 : f32
    %26 = vector.broadcast %cst_9 : f32 to vector<1x256xf32>
    %27 = arith.select %23, %25, %26 : vector<1x256xi1>, vector<1x256xf32>
    %c0_10 = arith.constant 0 : index
    %c0_11 = arith.constant 0 : index
    %c0_12 = arith.constant 0 : index
    %28 = vector.load %arg4[%c0_10, %c0_11, %c0_12] : memref<1x1x256xf32, #tpu.memory_space<vmem>>, vector<1x1x256xf32>
    %29 = vector.shape_cast %28 : vector<1x1x256xf32> to vector<1x256xf32>
    %30 = arith.addf %29, %27 : vector<1x256xf32>
    %c0_13 = arith.constant 0 : index
    %c0_14 = arith.constant 0 : index
    %c0_15 = arith.constant 0 : index
    %31 = vector.load %arg4[%c0_13, %c0_14, %c0_15] : memref<1x1x256xf32, #tpu.memory_space<vmem>>, vector<1x1x256xf32>
    %32 = vector.shape_cast %31 : vector<1x1x256xf32> to vector<1x256xf32>
    %33 = vector.shape_cast %30 : vector<1x256xf32> to vector<1x1x256xf32>
    tpu.vector_store %arg4[%c0_13, %c0_14, %c0_15], %33 {strides = array<i32>} : memref<1x1x256xf32, #tpu.memory_space<vmem>>, vector<1x1x256xf32>,
    %c0_16 = arith.constant 0 : index
    %c0_17 = arith.constant 0 : index
    %c0_18 = arith.constant 0 : index
    %34 = vector.load %arg5[%c0_16, %c0_17, %c0_18] : memref<1x1x256xf32, #tpu.memory_space<vmem>>, vector<1x1x256xf32>
    %35 = vector.shape_cast %34 : vector<1x1x256xf32> to vector<1x256xf32>
    %36 = arith.extui %23 : vector<1x256xi1> to vector<1x256xi32>
    %37 = arith.sitofp %36 : vector<1x256xi32> to vector<1x256xf32>
    %38 = arith.addf %35, %37 : vector<1x256xf32>
    %c0_19 = arith.constant 0 : index
    %c0_20 = arith.constant 0 : index
    %c0_21 = arith.constant 0 : index
    %39 = vector.load %arg5[%c0_19, %c0_20, %c0_21] : memref<1x1x256xf32, #tpu.memory_space<vmem>>, vector<1x1x256xf32>
    %40 = vector.shape_cast %39 : vector<1x1x256xf32> to vector<1x256xf32>
    %41 = vector.shape_cast %38 : vector<1x256xf32> to vector<1x1x256xf32>
    tpu.vector_store %arg5[%c0_19, %c0_20, %c0_21], %41 {strides = array<i32>} : memref<1x1x256xf32, #tpu.memory_space<vmem>>, vector<1x1x256xf32>,
    return
  }
  func.func @transform_0(%arg0: i32, %arg1: i32) -> (i32, i32, i32) {
    %c0_i32 = arith.constant 0 : i32
    %c0_i32_0 = arith.constant 0 : i32
    return %arg0, %c0_i32, %arg1 : i32, i32, i32
  }
  func.func @transform_1(%arg0: i32, %arg1: i32) -> (i32, i32, i32) {
    %c0_i32 = arith.constant 0 : i32
    %c0_i32_0 = arith.constant 0 : i32
    return %arg0, %c0_i32, %arg1 : i32, i32, i32
  }
  func.func @transform_2(%arg0: i32, %arg1: i32) -> (i32, i32, i32) {
    %c0_i32 = arith.constant 0 : i32
    %c0_i32_0 = arith.constant 0 : i32
    %c0_i32_1 = arith.constant 0 : i32
    return %arg0, %c0_i32, %c0_i32_0 : i32, i32, i32
  }
  func.func @transform_3(%arg0: i32, %arg1: i32) -> (i32, i32, i32) {
    %c0_i32 = arith.constant 0 : i32
    %c0_i32_0 = arith.constant 0 : i32
    %c0_i32_1 = arith.constant 0 : i32
    return %arg0, %c0_i32, %c0_i32_0 : i32, i32, i32
  }
}

</mosaic_0001>

<bundles_post_ra>
// kernel: tpu_custom_call.1
= control target key start
LH: loop header
LB: loop body
LE: loop exit
PB: predicated region body
PF: predicated region fallthrough
CT: control target
= control target key end

     0   :  { %9 = vsyncpa [#allocation3], 0  ;;  %s1090_s0 = inlined_call_operand.hbm [shape: f32[2,4,256], index: 0, kind: input, shape index: {}]   ;;  %s1091_s1 = inlined_call_operand.hbm [shape: s32[2,1,256], index: 1, kind: input, shape index: {}]   ;;  %s1092_s2 = inlined_call_operand.hbm [shape: f32[2,1,256], index: 2, kind: output, shape index: {0}]   ;;  %s1093_s3 = inlined_call_operand.hbm [shape: f32[2,1,256], index: 3, kind: output, shape index: {1}]  }
   0x1   :  { %11 = vsyncpa [#allocation3 + $0x1], 0 }
   0x2   :  { %12 = vsyncpa [#allocation6], 0 }
   0x3   :  { %14 = vsyncpa [#allocation6 + $0x1], 0 }
   0x4   :  { %15 = vsyncpa [#allocation4], 0 }
   0x5   :  { %17 = vsyncpa [#allocation4 + $0x1], 0 }
   0x6   :  { %18 = vsyncpa [#allocation9], 0 }
   0x7   :  { %20 = vsyncpa [#allocation9 + $0x1], 0  ;;  %s861_s12 = smov 0   ;;  %s863_s13 = smov 0  }
   0x8   :  { %s865_s14 = smov 0   ;;  %s867_s15 = smov 0  }
   0x9   :  { %s869_s16 = smov 0   ;;  %s871_s17 = smov 0  }
   0xa LB: > { %s554_s18 = sadd.s32 4294967295, %s833_s17   ;;  %s555_s19 = sadd.s32 4294967294, %s833_s17   ;;  %s833_s17 = sphi %s871_s17, %s26_s17   ;;  %s829_s16 = sphi %s869_s16, %s1107_s16   ;;  %s825_s15 = sphi %s867_s15, %s1106_s15   ;;  %s821_s14 = sphi %s865_s14, %s1105_s14   ;;  %s817_s13 = sphi %s863_s13, %s1104_s13   ;;  %s813_s12 = sphi %s861_s12, %s1103_s12  }
   0xb   : > { %s38_s20 = sadd.s32 1, %s829_s16  ;;  %s47_s21 = sadd.s32 1, %s821_s14 }
   0xc   : > { %p40_p0 = scmp.ge.s32.totalorder %s38_s20, 2  ;;  %p54_p1 = scmp.ne.s32.totalorder %s821_s14, %s817_s13 }
   0xd   : > { %p55_p2 = scmp.eq.s32.totalorder %s833_s17, 0  ;;  %p60_p3 = scmp.ne.s32.totalorder %s817_s13, %s813_s12 }
   0xe   : > { %s1109_s20 = smov (%p40_p0, %s38_s20), 0  ;;  %p61_p5 = scmp.eq.s32.totalorder %s554_s18, 0 }
   0xf   : > { %p902_p4 = por %p55_p2, %p54_p1  ;;  %s42_s23 = ssub.s32 %s829_s16, %s1109_s20 }
  0x10   : > { %p112_p6 = scmp.eq.s32.totalorder %s554_s18, 1  ;;  %p45_p7 = scmp.eq.s32.totalorder %s42_s23, 0 }
  0x11   : > { %p908_p8 = por %p61_p5, %p60_p3  ;;  %p118_p10 = scmp.eq.s32.totalorder %s555_s19, 1 }
  0x12   : > { %p912_p9 = por %p112_p6, %p54_p1  ;;  %p604_p13 = scmp.lt.s32.totalorder %s833_s17, 2 }
  0x13   : > { %s917_s26 = scalar_select %p45_p7, %s821_s14, %s47_s21  }
  0x14   : > { %p919_p11 = por %p118_p10, %p60_p3  ;;  %s926_s28 = sand.u32 1, %s821_s14  }
  0x15   : > { %s558_s29 = sshll.u32 %s926_s28, 3  ;;  %s578_s30 = sshll.u32 %s829_s16, 7 }
  0x16   : > { %s176_s6 = scalar_lea.hbm %s1090_s0, %s578_s30  ;;  %s168_s7 = scalar_lea.vmem [#allocation2], %s558_s29 }
  0x17   : > { %s178_s8 = sshll.u32 %s168_s7, 4  ;;  %p935_p0 = pnand %p604_p13, %p902_p4  ;;  %s179_s8 = int_to_ptr.vmem [resolvable:$true] %s178_s8 }
  0x18   : > { %p564_p1 = scmp.ge.s32.totalorder %s833_s17, 1  ;;  %p204_p2 = scmp.lt.s32.totalorder %s833_s17, 3 }
  0x19   : > { %s165_s10 = scalar_lea.sflag [#allocation3], %s926_s28  ;;  %p665_p3 = pneg %p935_p0 }
  0x1a   : > { %s676_s11 = scalar_lea.vmem %s179_s8, 128  ;;  %s835_s18 = smov [#allocation2]  }
  0x1b   : > { %p677_p5 = scmp.ne.s32.totalorder %s179_s8, %s676_s11  ;;  %s681_s19 = sshll.u32 %s835_s18, 4  ;;  %s682_s19 = int_to_ptr.vmem [resolvable:$false] %s681_s19 }
  0x1c   : > { %s683_s21 = scalar_lea.vmem %s682_s19, 256  ;;  %p684_p4 = scmp.lt.s32.totalorder %s179_s8, %s682_s19 }
  0x1d   : > { %p679_p6 = pnand %p677_p5, %p665_p3  ;;  %p685_p10 = scmp.lt.s32.totalorder %s683_s21, %s676_s11 }
  0x1f   : > { %p680_p7 = pneg %p679_p6  ;;  %p686_p13 = por %p685_p10, %p684_p4 }
  0x21   : > { %p687_p12 = pnand %p686_p13, %p680_p7 }
  0x23   : > { %690 = shalt.err (!%p687_p12)
}
  0x24   : > { %593 = dma.hbm_to_vmem [thread:$0]  (!%p935_p0), %s176_s6, 128, %s179_s8, %s165_s10  }
  0x25   : > { %p953_p5 = pnand %p564_p1, %p204_p2  ;;  %s561_s23 = sshll.u32 %s926_s28, 1 }
  0x26   : > { %s579_s29 = sshll.u32 %s829_s16, 5  ;;  %s189_s7 = scalar_lea.vmem [#allocation5], %s561_s23 }
  0x27   : > { %s197_s5 = scalar_lea.hbm %s1091_s1, %s579_s29  ;;  %s199_s11 = sshll.u32 %s189_s7, 4  ;;  %s200_s11 = int_to_ptr.vmem [resolvable:$true] %s199_s11 }
  0x28   : > { %s186_s18 = scalar_lea.sflag [#allocation6], %s926_s28  ;;  %s704_s19 = scalar_lea.vmem %s200_s11, 32 }
  0x29   : > { %p705_p12 = scmp.ne.s32.totalorder %s200_s11, %s704_s19  ;;  %s836_s6 = smov [#allocation5]  }
  0x2a   : > { %s709_s8 = sshll.u32 %s836_s6, 4  ;;  %s710_s8 = int_to_ptr.vmem [resolvable:$false] %s709_s8 }
  0x2b   : > { %p707_p6 = pnand %p705_p12, %p665_p3  ;;  %s711_s10 = scalar_lea.vmem %s710_s8, 64 }
  0x2c   : > { %p712_p1 = scmp.lt.s32.totalorder %s200_s11, %s710_s8  ;;  %p713_p2 = scmp.lt.s32.totalorder %s711_s10, %s704_s19 }
  0x2d   : > { %p708_p7 = pneg %p707_p6 }
  0x2e   : > { %p714_p4 = por %p713_p2, %p712_p1 }
  0x30   : > { %p715_p10 = pnand %p714_p4, %p708_p7 }
  0x32   : > { %718 = shalt.err (!%p715_p10)
}
  0x33   : > { %596 = dma.hbm_to_vmem [thread:$0]  (!%p935_p0), %s197_s5, 32, %s200_s11, %s186_s18  }
  0x34   : > { %208 = sbr.rel (%p953_p5) target bundleno = 169 (0xa9), region = 28  ;;  %s971_s28 = sand.u32 (!%p953_p5), 1, %s817_s13  }
  0x35   : > { %s565_s21 = sshll.u32 (!%p953_p5), %s971_s28, 3  ;;  %s211_s23 = scalar_lea.sflag (!%p953_p5), [#allocation3], %s971_s28 }
  0x36   : > { %s214_s29 = scalar_lea.vmem (!%p953_p5), [#allocation2], %s565_s21 }
  0x39   : > { %796 = dma.done.wait (%p908_p8), %s211_s23, 128  }
  0x3a   : > { %798 = vsyncadd (%p908_p8), %s211_s23, 4294967168  ;;  %s566_s9 = sshll.u32 %s971_s28, 1  ;;  %s220_s22 = scalar_lea.sflag [#allocation6], %s971_s28 }
  0x3b   : > { %s223_s30 = scalar_lea.vmem [#allocation5], %s566_s9 }
  0x3c   : > { %800 = dma.done.wait (%p908_p8), %s220_s22, 32  }
  0x3d   : > { %802 = vsyncadd (%p908_p8), %s220_s22, 4294967264  ;;  %v262_v0 = vlaneseq  ;;  %s989_s4 = scalar_lea.vmem [#allocation7], %s566_s9  ;;  %v837_v2 = vmov 0.0   ;;  %s255_s5 = scalar_lea.vmem [#allocation8], %s566_s9  ;;  %vm273_vm1 = vcmask 1043456   ;;  %v268_v3 = vld [vmem:[%s214_s29] sm:$0xff] }
  0x3e   : > { %v996_v4 = vld [vmem:[%s223_s30] sm:$0x3]  ;;  %v271_v5 = vcombine.high %v268_v3, %v268_v3  ;;  %v274_v6 = vsel %vm273_vm1, %v268_v3, -inf  ;;  %s580_s24 = sshll.u32 %s825_s15, 5  ;;  %s415_s7 = sshll.u32 %s255_s5, 4  ;;  %s1011_s7 = int_to_ptr.vmem [resolvable:$true] %s415_s7 }
  0x3f   : > { %vm985_vm0 = vcmp.lt.s32.totalorder %v262_v0, 256  ;;  %v275_v7 = vrot.slane %v274_v6, 4  ;;  %vm343_vm2 = vcmp.ne.s32.totalorder %v996_v4, 255  ;;  %s1009_s19 = scalar_lea.hbm %s1093_s3, %s580_s24  ;;  %s387_s6 = scalar_lea.sflag [#allocation9], %s971_s28 }
  0x40   : > { %266 = vst.msk [vmem:[%s989_s4] sm:$0x3] %vm985_vm0, %v837_v2  ;;  %267 = vst.msk [vmem:[%s255_s5] sm:$0x3] %vm985_vm0, %v837_v2  ;;  %v281_v8 = vsel %vm273_vm1, %v271_v5, -inf  ;;  %v569_v9 = vsel %vm343_vm2, 1.0, %v837_v2 }
  0x41   : > { %v276_v11 = vmax.f32 %v274_v6, %v275_v7  ;;  %v282_v12 = vrot.slane %v281_v8, 4  ;;  %s719_s8 = scalar_lea.vmem %s1011_s7, 32  ;;  %s838_s10 = smov [#allocation8]  }
  0x42   : > { %p720_p8 = scmp.ne.s32.totalorder %s1011_s7, %s719_s8  ;;  %s723_s21 = sshll.u32 %s838_s10, 4  ;;  %s724_s21 = int_to_ptr.vmem [resolvable:$false] %s723_s21 }
  0x43   : > { %v277_v14 = vrot.slane %v276_v11, 2  ;;  %v283_v15 = vmax.f32 %v281_v8, %v282_v12  ;;  %s725_s23 = scalar_lea.vmem %s724_s21, 64  ;;  %p726_p13 = scmp.lt.s32.totalorder %s1011_s7, %s724_s21 }
  0x44   : > { %p721_p0 = pnand %p720_p8, %p912_p9  ;;  %p727_p5 = scmp.lt.s32.totalorder %s725_s23, %s719_s8 }
  0x46   : > { %p722_p3 = pneg %p721_p0  ;;  %p728_p12 = por %p727_p5, %p726_p13 }
  0x47   : > { %v376_v10 = vld [vmem:[%s255_s5] sm:$0x3] }
  0x48   : > { %v379_v13 = vadd.f32 %v569_v9, %v376_v10  ;;  %p729_p6 = pnand %p728_p12, %p722_p3 }
  0x4a   : > { %380 = vst.msk [vmem:[%s255_s5] sm:$0x3] %vm985_vm0, %v379_v13 }
  0x4b   : > { %732 = shalt.err (!%p729_p6)
}
  0x4c   : > { %s733_s29 = scalar_lea.hbm %s1009_s19, 32  ;;  %s737_s30 = scalar_lea.hbm %s1093_s3, 64 }
  0x4d   : > { %p734_p7 = scmp.ne.s32.totalorder %s1009_s19, %s733_s29  ;;  %p738_p4 = scmp.lt.s32.totalorder %s1009_s19, %s1093_s3 }
  0x4e   : > { %p739_p10 = scmp.lt.s32.totalorder %s737_s30, %s733_s29 }
  0x4f   : > { %p735_p1 = pnand %p734_p7, %p912_p9 }
  0x50   : > { %p740_p8 = por %p739_p10, %p738_p4 }
  0x51   : > { %p736_p2 = pneg %p735_p1 }
  0x53   : > { %p741_p0 = pnand %p740_p8, %p736_p2 }
  0x55   : > { %744 = shalt.err (!%p741_p0)
}
  0x56   : > { %587 = dma.vmem_to_hbm [thread:$0]  (%p912_p9), %s1011_s7, 32, %s1009_s19, %s387_s6   ;;  %v278_v16 = vmax.f32 %v276_v11, %v277_v14  ;;  %v284_v17 = vrot.slane %v283_v15, 2  ;;  %v313_v26 = vshrl.u32 %v262_v0, 7  ;;  %v839_v62 = vmov 1966171168  }
  0x57   : > { %v354_v63 = vunpack.c.l.s4 %v839_v62  ;;  %s401_s7 = sshll.u32 %s989_s4, 4  ;;  %s399_s6 = scalar_lea.hbm %s1092_s2, %s580_s24  ;;  %s402_s7 = int_to_ptr.vmem [resolvable:$true] %s401_s7 }
  0x58   : > { %v279_v18 = vrot.slane %v278_v16, 1  ;;  %v285_v19 = vmax.f32 %v283_v15, %v284_v17  ;;  %v316_v27 = vsub.s32 0, %v313_v26  ;;  %v320_v28 = vsub.s32 1, %v313_v26  ;;  %v369_v15 = vld [vmem:[%s989_s4] sm:$0x3]  ;;  %s382_s8 = scalar_lea.sflag [#allocation4], %s971_s28 }
  0x59   : > { %v355_v6 = vunpack.c.0.s8 %v354_v63  ;;  %s745_s10 = scalar_lea.vmem %s402_s7, 32  ;;  %s840_s21 = smov [#allocation7]  }
  0x5a   : > { %v280_v20 = vmax.f32 %v278_v16, %v279_v18  ;;  %v286_v21 = vrot.slane %v285_v19, 1  ;;  %v317_v29 = vrot.slane %v996_v4, %v316_v27  ;;  %v321_v30 = vrot.slane %v996_v4, %v320_v28  ;;  %p746_p3 = scmp.ne.s32.totalorder %s402_s7, %s745_s10  ;;  %s749_s23 = sshll.u32 %s840_s21, 4  ;;  %s750_s23 = int_to_ptr.vmem [resolvable:$false] %s749_s23 }
  0x5b   : > { %v358_v11 = vsub.s32 %v355_v6, %v313_v26  ;;  %s751_s29 = scalar_lea.vmem %s750_s23, 64  ;;  %p752_p12 = scmp.lt.s32.totalorder %s402_s7, %s750_s23 }
  0x5c   : > { %v287_v22 = vmax.f32 %v285_v19, %v286_v21  ;;  %vm322_vm3 = vcmp.eq.s32.totalorder %v313_v26, %v317_v29  ;;  %vm323_vm4 = vcmp.eq.s32.totalorder %v313_v26, %v321_v30  ;;  %p747_p13 = pnand %p746_p3, %p912_p9  ;;  %p753_p6 = scmp.lt.s32.totalorder %s751_s29, %s745_s10 }
  0x5e   : > { %v290_v23 = vcombine.low %v280_v20, %v287_v22  ;;  %p748_p5 = pneg %p747_p13  ;;  %p754_p7 = por %p753_p6, %p752_p12 }
  0x60   : > { %v292_v24 = vsub.f32 %v268_v3, %v290_v23  ;;  %p755_p1 = pnand %p754_p7, %p748_p5 }
  0x62   : > { %v293_v25 = vmul.f32 1.442695, %v292_v24  ;;  %v325_v31 = vcombine.high %v292_v24, %v292_v24  ;;  %v327_v33 = vsel %vm322_vm3, %v292_v24, 0.0 }
  0x63   : > { %v329_v39 = vsel %vm273_vm1, %v327_v33, 0.0 }
  0x64   : > { %657 = vpow2.f32 %v293_v25  ;;  %v328_v37 = vsel %vm323_vm4, %v325_v31, 0.0  ;;  %v330_v45 = vrot.slane %v329_v39, 4 }
  0x65   : > { %v336_v42 = vsel %vm273_vm1, %v328_v37, 0.0 }
  0x66   : > { %v337_v48 = vrot.slane %v336_v42, 4  ;;  %v331_v51 = vadd.f32 %v330_v45, %v329_v39 }
  0x68   : > { %v338_v54 = vadd.f32 %v337_v48, %v336_v42  ;;  %v332_v56 = vrot.slane %v331_v51, 2 }
  0x6a   : > { %v339_v57 = vrot.slane %v338_v54, 2  ;;  %v333_v58 = vadd.f32 %v332_v56, %v331_v51 }
  0x6c   : > { %v340_v59 = vadd.f32 %v339_v57, %v338_v54  ;;  %v334_v60 = vrot.slane %v333_v58, 1 }
  0x6e   : > { %v341_v61 = vrot.slane %v340_v59, 1  ;;  %v335_v0 = vadd.f32 %v334_v60, %v333_v58 }
  0x70   : > { %v342_v3 = vadd.f32 %v341_v61, %v340_v59 }
  0x71   : > { %v658_v32 = vpop.eup %657 }
  0x72   : > { %v296_v34 = vcombine.high %v658_v32, %v658_v32  ;;  %v298_v35 = vsel %vm273_vm1, %v658_v32, 0.0 }
  0x73   : > { %v299_v36 = vrot.slane %v298_v35, 4 }
  0x74   : > { %v305_v38 = vsel %vm273_vm1, %v296_v34, 0.0 }
  0x75   : > { %v300_v40 = vadd.f32 %v299_v36, %v298_v35  ;;  %v306_v41 = vrot.slane %v305_v38, 4 }
  0x77   : > { %v301_v43 = vrot.slane %v300_v40, 2  ;;  %v307_v44 = vadd.f32 %v306_v41, %v305_v38 }
  0x79   : > { %v302_v46 = vadd.f32 %v301_v43, %v300_v40  ;;  %v308_v47 = vrot.slane %v307_v44, 2 }
  0x7b   : > { %v303_v49 = vrot.slane %v302_v46, 1  ;;  %v309_v50 = vadd.f32 %v308_v47, %v307_v44 }
  0x7d   : > { %v304_v52 = vadd.f32 %v303_v49, %v302_v46  ;;  %v310_v53 = vrot.slane %v309_v50, 1 }
  0x7f   : > { %v311_v55 = vadd.f32 %v310_v53, %v309_v50  ;;  %659 = vlog2.f32 %v304_v52 }
  0x81   : > { %661 = vlog2.f32 %v311_v55 }
  0x8c   : > { %v660_v2 = vpop.eup %659 }
  0x8d   : > { %v345_v5 = vmul.f32 0.6931472, %v660_v2 }
  0x8e   : > { %v662_v7 = vpop.eup %661 }
  0x8f   : > { %v347_v8 = vmul.f32 0.6931472, %v662_v7  ;;  %v348_v9 = vsub.f32 %v345_v5, %v335_v0 }
  0x91   : > { %v349_v10 = vsub.f32 %v347_v8, %v342_v3 }
  0x93   : > { %v352_v12 = vcombine.low %v348_v9, %v349_v10 }
  0x95   : > { %v359_v13 = vrot.slane %v352_v12, %v358_v11 }
  0x97   : > { %v366_v14 = vrot.slane %v359_v13, %v358_v11 }
  0x99   : > { %v368_v16 = vsel %vm343_vm2, %v366_v14, 0.0 }
  0x9a   : > { %v370_v17 = vadd.f32 %v369_v15, %v368_v16 }
  0x9c   : > { %375 = vst.msk [vmem:[%s989_s4] sm:$0x3] %vm985_vm0, %v370_v17 }
  0x9d   : > { %758 = shalt.err (!%p755_p1)
}
  0x9e   : > { %s759_s15 = scalar_lea.hbm %s399_s6, 32  ;;  %s763_s24 = scalar_lea.hbm %s1092_s2, 64 }
  0x9f   : > { %p760_p2 = scmp.ne.s32.totalorder %s399_s6, %s759_s15  ;;  %p764_p8 = scmp.lt.s32.totalorder %s399_s6, %s1092_s2 }
  0xa0   : > { %p765_p0 = scmp.lt.s32.totalorder %s763_s24, %s759_s15 }
  0xa1   : > { %p761_p4 = pnand %p760_p2, %p912_p9 }
  0xa2   : > { %p766_p3 = por %p765_p0, %p764_p8 }
  0xa3   : > { %p762_p10 = pneg %p761_p4 }
  0xa5   : > { %p767_p13 = pnand %p766_p3, %p762_p10 }
  0xa7   : > { %770 = shalt.err (!%p767_p13)
}
  0xa8   : > { %586 = dma.vmem_to_hbm [thread:$0]  (%p912_p9), %s402_s7, 32, %s399_s6, %s382_s8  }
  0xa9 PF: > { %s427_s30 = sand.u32 1, %s813_s12   ;;  %p1102_p5 = scmp.ge.s32.totalorder %s833_s17, 2 }
  0xaa   : > { %s428_s5 = scalar_lea.sflag [#allocation4], %s427_s30 }
  0xab   : > { %p598_p12 = pnand %p1102_p5, %p919_p11 }
  0xad   : > { %p599_p6 = pneg %p598_p12 }
  0xaf   : > { %804 = dma.done.wait (%p599_p6), %s428_s5, 32  }
  0xb0   : > { %806 = vsyncadd (%p599_p6), %s428_s5, 4294967264  ;;  %s437_s11 = scalar_lea.sflag [#allocation9], %s427_s30 }
  0xb1   : > { %808 = dma.done.wait (%p599_p6), %s437_s11, 32  }
  0xb2   : > { %810 = vsyncadd (%p599_p6), %s437_s11, 4294967264  ;;  %s26_s17 = sadd.s32 1, %s833_s17   ;;  %s1103_s12 = smov %s817_s13 }
  0xb3   : > { %p23_p7 = scmp.ge.s32.totalorder %s26_s17, 4   ;;  %s1104_s13 = smov %s821_s14 }
  0xb4   : > { %s1105_s14 = smov %s917_s26  ;;  %s1106_s15 = smov %s829_s16 }
  0xb5   : > { %s1107_s16 = smov %s1109_s20  ;;  %25 = sbr.rel (!%p23_p7) target bundleno = 10 (0xa), region = 107 }
  0xba   :  { %442 = vsyncpa [#allocation3], 1 }
  0xbb   :  { %444 = vsyncpa [#allocation3 + $0x1], 1 }
  0xbc   :  { %445 = vsyncpa [#allocation6], 1 }
  0xbd   :  { %447 = vsyncpa [#allocation6 + $0x1], 1 }
  0xbe   :  { %448 = vsyncpa [#allocation4], 1 }
  0xbf   :  { %450 = vsyncpa [#allocation4 + $0x1], 1 }
  0xc0   :  { %451 = vsyncpa [#allocation9], 1 }
  0xc1   :  { %453 = vsyncpa [#allocation9 + $0x1], 1 }

</bundles_post_ra>
